<compile_context>
chip_gen: v6e
topology: v6e:2x2x1
jax: 0.10.0
libtpu: 0.0.40
codegen_flags: <defaults>
</compile_context>

<pallas_src>
import functools

import jax
import jax.numpy as jnp
from jax.experimental import pallas as pl
from jax.experimental.pallas import tpu as pltpu


def _round_up(n, m):
    return ((n + m - 1) // m) * m


def _mlp_kernel(x_ref, w1_ref, b1_ref, w2_ref, b2_ref, o_ref):
    # In-kernel bf16 cast of the activation tile (VPU op, hidden under DMA/MXU).
    x = x_ref[...].astype(jnp.bfloat16)
    # Layer 1: bf16 MXU matmul, f32 accumulation (K=32 is fine; MXU pads
    # the contraction internally).
    h = jnp.dot(x, w1_ref[...], preferred_element_type=jnp.float32)
    # f32 epilogue (bias + ReLU). Bias is a single (1, H) VMEM row broadcast
    # over the batch tile. Keep f32: v5e has no bf16 VPU datapath.
    h = jnp.maximum(h + b1_ref[...], 0.0)
    # Layer 2: bf16 MXU matmul, f32 accumulation, f32 bias epilogue.
    y = jnp.dot(h.astype(jnp.bfloat16), w2_ref[...],
                preferred_element_type=jnp.float32)
    o_ref[...] = (y + b2_ref[...]).astype(o_ref.dtype)


def prepare_params(w1, b1, w2, b2):
    """One-time dtype prep (amortized across calls).

    Weights are stored [in, out] and cast to bf16 for the MXU; biases stay
    f32 as (1, N) rows for the f32 epilogue. No explicit lane padding --
    Mosaic handles internal VMEM layout padding of the small weight blocks.
    """
    return (w1.astype(jnp.bfloat16),
            b1.reshape(1, -1).astype(jnp.float32),
            w2.astype(jnp.bfloat16),
            b2.reshape(1, -1).astype(jnp.float32))


def _choose_bm(batch, bm_max):
    """Trace-time (static) batch-tile choice.

    Large tiles amortize the ~0.35 us per-grid-step overhead, but keep at
    least 2 grid steps when the batch allows it so the "parallel" batch axis
    can be sharded across v7x's 2 TensorCores. Tiles stay sublane (8-row)
    aligned; a partial last tile is handled by Pallas' masked block access
    (this kernel is purely row-wise, so garbage padding rows never
    contaminate real rows and their outputs are dropped on the write).
    """
    bm = min(bm_max, _round_up(batch, 8))
    if batch > 8:
        n_tiles = max(2, pl.cdiv(batch, bm))
        bm = _round_up(pl.cdiv(batch, n_tiles), 8)
    return bm


@functools.partial(jax.jit, static_argnames=("bm",))
def deploy_forward(x, w1, b1, w2, b2, *, bm=512):
    """Pallas implementation of deploy(model).forward(x) == model(x).

    x  : [B, D_in]      float32 (unpadded)
    w1 : [D_in, H]      bf16    (pre-transposed [in, out])
    b1 : [1, H]         f32
    w2 : [H, D_out]     bf16
    b2 : [1, D_out]     f32
    bm : max batch tile (rows per grid step)
    returns [B, D_out] float32
    """
    B, d_in = x.shape
    d_in_w, hidden = w1.shape
    _, d_out = w2.shape
    assert d_in == d_in_w, "x / w1 inner-dimension mismatch"

    bm_t = _choose_bm(B, bm)
    n_tiles = pl.cdiv(B, bm_t)

    return pl.pallas_call(
        _mlp_kernel,
        out_shape=jax.ShapeDtypeStruct((B, d_out), jnp.float32),
        grid=(n_tiles,),
        in_specs=[
            # x tile: last dim equals full array dim (32) -> (8,128) rule OK.
            pl.BlockSpec((bm_t, d_in), lambda i: (i, 0)),
            # Grid-invariant weights/biases: constant index maps keep the
            # blocks resident in VMEM across grid steps.
            pl.BlockSpec((d_in, hidden), lambda i: (0, 0)),    # W1
            pl.BlockSpec((1, hidden), lambda i: (0, 0)),       # b1
            pl.BlockSpec((hidden, d_out), lambda i: (0, 0)),   # W2
            pl.BlockSpec((1, d_out), lambda i: (0, 0)),        # b2
        ],
        # True-width output: no padded buffer + XLA slice round trip.
        out_specs=pl.BlockSpec((bm_t, d_out), lambda i: (i, 0)),
        compiler_params=pltpu.CompilerParams(
            # Batch tiles are independent -> shard across TCs (2x on v7x).
            dimension_semantics=("parallel",),
            # Tiny VMEM footprint; explicit budget safe on v7x's 64 MiB too.
            vmem_limit_bytes=32 * 1024 * 1024,
        ),
    )(x, w1, b1, w2, b2)


def _init_params(key, d_in=32, hidden=64, d_out=32):
    # Deterministic synthetic weights (torch.nn.Linear-like init scale),
    # stored pre-transposed as [in, out].
    k1, k2, k3, k4 = jax.random.split(key, 4)
    s1 = 1.0 / jnp.sqrt(d_in)
    s2 = 1.0 / jnp.sqrt(hidden)
    w1 = jax.random.uniform(k1, (d_in, hidden), jnp.float32, -s1, s1)
    b1 = jax.random.uniform(k2, (1, hidden), jnp.float32, -s1, s1)
    w2 = jax.random.uniform(k3, (hidden, d_out), jnp.float32, -s2, s2)
    b2 = jax.random.uniform(k4, (1, d_out), jnp.float32, -s2, s2)
    return w1, b1, w2, b2


def _reference(x, w1, b1, w2, b2):
    h = jnp.maximum(x @ w1 + b1, 0.0)
    return h @ w2 + b2


if __name__ == "__main__":
    key = jax.random.PRNGKey(0)
    kx, kp = jax.random.split(key)

    # Batch large enough to exercise the tiled/parallel grid (2 steps of 128
    # rows), model dims as in the synthetic spec.
    B, D_IN, HIDDEN, D_OUT = 256, 32, 64, 32
    x = jax.random.normal(kx, (B, D_IN), jnp.float32)
    w1, b1, w2, b2 = _init_params(kp, D_IN, HIDDEN, D_OUT)

    # One-time weight dtype preparation (amortized across calls).
    w1_p, b1_p, w2_p, b2_p = prepare_params(w1, b1, w2, b2)

    out = deploy_forward(x, w1_p, b1_p, w2_p, b2_p, bm=512)
    out = jax.block_until_ready(out)

    ref = _reference(x, w1, b1, w2, b2)
    assert out.shape == (B, D_OUT)
    # bf16 matmul inputs -> loosened tolerance vs the f32 reference.
    assert jnp.allclose(out, ref, atol=5e-2, rtol=5e-2), "mismatch vs JAX reference"

    print("KERNEL_OK")
</pallas_src>

<mosaic_0001>
module attributes {stable_mosaic.version = 11 : i64} {
  func.func @_mlp_kernel(%arg0: i32, %arg1: memref<128x32xf32, #tpu.memory_space<vmem>>, %arg2: memref<32x64xbf16, #tpu.memory_space<vmem>>, %arg3: memref<1x64xf32, #tpu.memory_space<vmem>>, %arg4: memref<64x32xbf16, #tpu.memory_space<vmem>>, %arg5: memref<1x32xf32, #tpu.memory_space<vmem>>, %arg6: memref<128x32xf32, #tpu.memory_space<vmem>>) attributes {dimension_semantics = [#tpu.dimension_semantics<parallel>], iteration_bounds = array<i64: 2>, scalar_prefetch = 0 : i64, scratch_operands = 0 : i64, tpu.core_type = #tpu.core_type<tc>, window_params = [{transform_indices = @transform_0, window_bounds = array<i64: 128, 32>}, {pipeline_mode = #tpu.pipeline_mode<synchronous>, transform_indices = @transform_1, window_bounds = array<i64: 32, 64>}, {pipeline_mode = #tpu.pipeline_mode<synchronous>, transform_indices = @transform_2, window_bounds = array<i64: 1, 64>}, {pipeline_mode = #tpu.pipeline_mode<synchronous>, transform_indices = @transform_3, window_bounds = array<i64: 64, 32>}, {pipeline_mode = #tpu.pipeline_mode<synchronous>, transform_indices = @transform_4, window_bounds = array<i64: 1, 32>}, {transform_indices = @transform_5, window_bounds = array<i64: 128, 32>}]} {
    %c0 = arith.constant 0 : index
    %c0_0 = arith.constant 0 : index
    %0 = vector.load %arg1[%c0, %c0_0] : memref<128x32xf32, #tpu.memory_space<vmem>>, vector<128x32xf32>
    %1 = arith.truncf %0 : vector<128x32xf32> to vector<128x32xbf16>
    %c0_1 = arith.constant 0 : index
    %c0_2 = arith.constant 0 : index
    %2 = vector.load %arg2[%c0_1, %c0_2] : memref<32x64xbf16, #tpu.memory_space<vmem>>, vector<32x64xbf16>
    %cst = arith.constant dense<0.000000e+00> : vector<128x64xf32>
    %3 = tpu.matmul %1, %2, %cst {dimension_numbers = #tpu.dot_dimension_numbers<[1], [0], [0], [1], [0, 0, 1, 1], [], []>} : vector<128x32xbf16>, vector<32x64xbf16>, vector<128x64xf32> -> vector<128x64xf32>
    %c0_3 = arith.constant 0 : index
    %c0_4 = arith.constant 0 : index
    %4 = vector.load %arg3[%c0_3, %c0_4] : memref<1x64xf32, #tpu.memory_space<vmem>>, vector<1x64xf32>
    %5 = vector.broadcast %4 : vector<1x64xf32> to vector<128x64xf32>
    %6 = arith.addf %3, %5 : vector<128x64xf32>
    %cst_5 = arith.constant 0.000000e+00 : f32
    %7 = vector.broadcast %cst_5 : f32 to vector<128x64xf32>
    %8 = arith.maximumf %6, %7 : vector<128x64xf32>
    %9 = arith.truncf %8 : vector<128x64xf32> to vector<128x64xbf16>
    %c0_6 = arith.constant 0 : index
    %c0_7 = arith.constant 0 : index
    %10 = vector.load %arg4[%c0_6, %c0_7] : memref<64x32xbf16, #tpu.memory_space<vmem>>, vector<64x32xbf16>
    %cst_8 = arith.constant dense<0.000000e+00> : vector<128x32xf32>
    %11 = tpu.matmul %9, %10, %cst_8 {dimension_numbers = #tpu.dot_dimension_numbers<[1], [0], [0], [1], [0, 0, 1, 1], [], []>} : vector<128x64xbf16>, vector<64x32xbf16>, vector<128x32xf32> -> vector<128x32xf32>
    %c0_9 = arith.constant 0 : index
    %c0_10 = arith.constant 0 : index
    %12 = vector.load %arg5[%c0_9, %c0_10] : memref<1x32xf32, #tpu.memory_space<vmem>>, vector<1x32xf32>
    %13 = vector.broadcast %12 : vector<1x32xf32> to vector<128x32xf32>
    %14 = arith.addf %11, %13 : vector<128x32xf32>
    %c0_11 = arith.constant 0 : index
    %c0_12 = arith.constant 0 : index
    %15 = vector.load %arg6[%c0_11, %c0_12] : memref<128x32xf32, #tpu.memory_space<vmem>>, vector<128x32xf32>
    tpu.vector_store %arg6[%c0_11, %c0_12], %14 {strides = array<i32>} : memref<128x32xf32, #tpu.memory_space<vmem>>, vector<128x32xf32>,
    return
  }
  func.func @transform_0(%arg0: i32) -> (i32, i32) {
    %c0_i32 = arith.constant 0 : i32
    %c0_i32_0 = arith.constant 0 : i32
    return %arg0, %c0_i32 : i32, i32
  }
  func.func @transform_1(%arg0: i32) -> (i32, i32) {
    %c0_i32 = arith.constant 0 : i32
    %c0_i32_0 = arith.constant 0 : i32
    %c0_i32_1 = arith.constant 0 : i32
    return %c0_i32, %c0_i32_0 : i32, i32
  }
  func.func @transform_2(%arg0: i32) -> (i32, i32) {
    %c0_i32 = arith.constant 0 : i32
    %c0_i32_0 = arith.constant 0 : i32
    %c0_i32_1 = arith.constant 0 : i32
    return %c0_i32, %c0_i32_0 : i32, i32
  }
  func.func @transform_3(%arg0: i32) -> (i32, i32) {
    %c0_i32 = arith.constant 0 : i32
    %c0_i32_0 = arith.constant 0 : i32
    %c0_i32_1 = arith.constant 0 : i32
    return %c0_i32, %c0_i32_0 : i32, i32
  }
  func.func @transform_4(%arg0: i32) -> (i32, i32) {
    %c0_i32 = arith.constant 0 : i32
    %c0_i32_0 = arith.constant 0 : i32
    %c0_i32_1 = arith.constant 0 : i32
    return %c0_i32, %c0_i32_0 : i32, i32
  }
  func.func @transform_5(%arg0: i32) -> (i32, i32) {
    %c0_i32 = arith.constant 0 : i32
    %c0_i32_0 = arith.constant 0 : i32
    return %arg0, %c0_i32 : i32, i32
  }
}

</mosaic_0001>

<bundles_post_ra>
// kernel: deploy_forward.1
= control target key start
LH: loop header
LB: loop body
LE: loop exit
PB: predicated region body
PF: predicated region fallthrough
CT: control target
= control target key end

     0   :  { %s808_s18 = smov 0   ;;  %s924_s0 = inlined_call_operand.vmem [shape: f32[256,32], index: 0, kind: input, shape index: {}]   ;;  %s925_s1 = inlined_call_operand.vmem [shape: bf16[32,64], index: 1, kind: input, shape index: {}]   ;;  %s926_s2 = inlined_call_operand.vmem [shape: f32[1,64], index: 2, kind: input, shape index: {}]   ;;  %s927_s3 = inlined_call_operand.vmem [shape: bf16[64,32], index: 3, kind: input, shape index: {}]   ;;  %s928_s4 = inlined_call_operand.vmem [shape: f32[1,32], index: 4, kind: input, shape index: {}]   ;;  %s929_s5 = inlined_call_operand.vmem [shape: f32[256,32], index: 5, kind: output, shape index: {}]  }
   0x1 LB: > { %s655_s19 = sadd.s32 4294967295, %s776_s18   ;;  %p659_p0 = scmp.ge.s32.totalorder %s776_s18, 1  ;;  %s776_s18 = sphi %s808_s18, %s15_s18  }
   0x2   : > { %p188_p1 = scmp.lt.s32.totalorder %s776_s18, 3 }
   0x4   : > { %p189_p2 = pnand %p659_p0, %p188_p1 }
   0x5   : > { %s660_s22 = sshll.u32 (!%p189_p2), %s655_s19, 4 }
   0x6   : > { %192 = sbr.rel (%p189_p2) target bundleno = 452 (0x1c4), region = 40  ;;  %p217_p3 = scmp.lt.s32.totalorder (!%p189_p2), %s660_s22, 31 }
   0xb   : > { %v764_v0 = vld [vmem:[%s925_s1 + $0x8] sm:$0xff]   ;;  %v765_v1 = vld [vmem:[%s925_s1] sm:$0xff]   ;;  %v766_v2 = vld [vmem:[%s927_s3 + $0x18] sm:$0xff]   ;;  %s931_s22 = smov (!%p217_p3, %s660_s22), 31  ;;  %vm276_vm0 = vcmask 261120   ;;  %vm461_vm1 = vcmask 523264  }
   0xc   : > { %712 = vmatprep.subr.bf16.mxu0 %v764_v0  ;;  %732 = vmatprep.subr.bf16.mxu1 %v766_v2  ;;  %s661_s27 = sshll.u32 %s931_s22, 3  ;;  %v767_v27 = vld [vmem:[%s927_s3 + $0x10] sm:$0xff]   ;;  %v768_v28 = vld [vmem:[%s927_s3 + $0x8] sm:$0xff]   ;;  %v769_v29 = vld [vmem:[%s927_s3] sm:$0xff]  }
   0xd   : > { %713 = vmatpush3.bf16.msra.mxu0 %v764_v0  ;;  %733 = vmatpush3.bf16.msra.mxu1 %v766_v2  ;;  %s833_s30 = scalar_lea.vmem %s924_s0, %s661_s27  ;;  %v664_v32 = vld [vmem:[%s926_s2] ss:$0 sm:$0xff]  ;;  %s887_s19 = scalar_lea.vmem %s929_s5, %s661_s27 }
   0xe   : > { %714 = vmatprep.subr.bf16.mxu0 %v765_v1  ;;  %v229_v3 = vld [vmem:[%s833_s30] sm:$0xff]  ;;  %v230_v4 = vld [vmem:[%s833_s30 + $0x8] sm:$0xff]  ;;  %v231_v5 = vld [vmem:[%s833_s30 + $0x10] sm:$0xff]  ;;  %734 = vmatprep.subr.bf16.mxu1 %v767_v27 }
   0xf   : > { %v245_v6 = vpack.c.bf16 %v230_v4, %v229_v3  ;;  %v232_v7 = vld [vmem:[%s833_s30 + $0x18] sm:$0xff]  ;;  %v233_v8 = vld [vmem:[%s833_s30 + $0x20] sm:$0xff]  ;;  %v234_v9 = vld [vmem:[%s833_s30 + $0x28] sm:$0xff] }
  0x10   : > { %v246_v10 = vpack.c.bf16 %v232_v7, %v231_v5  ;;  %v247_v11 = vpack.c.bf16 %v234_v9, %v233_v8  ;;  %v235_v12 = vld [vmem:[%s833_s30 + $0x30] sm:$0xff]  ;;  %v236_v13 = vld [vmem:[%s833_s30 + $0x38] sm:$0xff]  ;;  %v237_v14 = vld [vmem:[%s833_s30 + $0x40] sm:$0xff] }
  0x11   : > { %715 = vmatpush3.bf16.msra.mxu0 %v765_v1  ;;  %716 = vmatprep.mubr.msk.bf16.mxu0 %vm276_vm0, %v245_v6  ;;  %v238_v15 = vld [vmem:[%s833_s30 + $0x48] sm:$0xff]  ;;  %v248_v16 = vpack.c.bf16 %v236_v13, %v235_v12  ;;  %v239_v18 = vld [vmem:[%s833_s30 + $0x50] sm:$0xff]  ;;  %v240_v19 = vld [vmem:[%s833_s30 + $0x58] sm:$0xff] }
  0x12   : > { %v249_v17 = vpack.c.bf16 %v238_v15, %v237_v14  ;;  %v241_v20 = vld [vmem:[%s833_s30 + $0x60] sm:$0xff]  ;;  %v242_v21 = vld [vmem:[%s833_s30 + $0x68] sm:$0xff]  ;;  %v250_v22 = vpack.c.bf16 %v240_v19, %v239_v18  ;;  %v243_v24 = vld [vmem:[%s833_s30 + $0x70] sm:$0xff]  ;;  %735 = vmatpush3.bf16.msra.mxu1 %v767_v27 }
  0x13   : > { %v251_v23 = vpack.c.bf16 %v242_v21, %v241_v20  ;;  %v244_v25 = vld [vmem:[%s833_s30 + $0x78] sm:$0xff]  ;;  %736 = vmatprep.subr.bf16.mxu1 %v768_v28 }
  0x14   : > { %717 = vmatmul.mubr.msk.bf16.vlgmr.msra.gmra.mxu0 %vm276_vm0, %v246_v10  ;;  %v252_v26 = vpack.c.bf16 %v244_v25, %v243_v24 }
  0x15   : > { %720 = vmatprep.mubr.msk.bf16.mxu0 %vm276_vm0, %v247_v11 }
  0x16   : > { %737 = vmatpush3.bf16.msra.mxu1 %v768_v28 }
  0x17   : > { %738 = vmatprep.subr.bf16.mxu1 %v769_v29 }
  0x1a   : > { %739 = vmatpush3.bf16.msra.mxu1 %v769_v29 }
  0x1c   : > { %721 = vmatmul.mubr.msk.bf16.gmra.mxu0 %vm276_vm0, %v248_v16 }
  0x1d   : > { %724 = vmatprep.mubr.msk.bf16.mxu0 %vm276_vm0, %v249_v17 }
  0x24   : > { %725 = vmatmul.mubr.msk.bf16.gmra.mxu0 %vm276_vm0, %v250_v22 }
  0x25   : > { %728 = vmatprep.mubr.msk.bf16.mxu0 %vm276_vm0, %v251_v23  ;;  %v675_v23 = vld [vmem:[%s928_s4] ss:$0 sm:$0xff] }
  0x2c   : > { %729 = vmatmul.mubr.msk.bf16.gmra.mxu0 %vm276_vm0, %v252_v26 }
  0xd4   : > { %v718_v30 = vpop.f32.mrf.mxu0 }
  0xd5   : > { %v344_v36 = vadd.f32 %v718_v30, %v664_v32 }
  0xd6   : > { %v335_v31 = vpop.f32.mrf.mxu0 }
  0xd7   : > { %v336_v34 = vadd.f32 %v664_v32, %v335_v31  ;;  %v400_v43 = vmax.f32 %v344_v36, 0.0 }
  0xd8   : > { %v719_v33 = vpop.f32.mrf.mxu0 }
  0xd9   : > { %v347_v35 = vadd.f32 %v719_v33, %v664_v32  ;;  %v398_v41 = vmax.f32 %v336_v34, 0.0 }
  0xda   : > { %v338_v37 = vpop.f32.mrf.mxu0 }
  0xdb   : > { %v339_v38 = vadd.f32 %v664_v32, %v338_v37  ;;  %v401_v39 = vmax.f32 %v347_v35, 0.0 }
  0xdc   : > { %v722_v40 = vpop.f32.mrf.mxu0 }
  0xdd   : > { %v399_v42 = vmax.f32 %v339_v38, 0.0  ;;  %v415_v46 = vpack.c.bf16 %v401_v39, %v400_v43  ;;  %v360_v50 = vadd.f32 %v722_v40, %v664_v32 }
  0xde   : > { %v351_v44 = vpop.f32.mrf.mxu0 }
  0xdf   : > { %v414_v45 = vpack.c.bf16 %v399_v42, %v398_v41  ;;  %v352_v48 = vadd.f32 %v664_v32, %v351_v44  ;;  %v404_v57 = vmax.f32 %v360_v50, 0.0 }
  0xe0   : > { %v723_v47 = vpop.f32.mrf.mxu0 }
  0xe1   : > { %v363_v49 = vadd.f32 %v723_v47, %v664_v32  ;;  %740 = vmatprep.mubr.msk.bf16.mxu1 %vm461_vm1, %v414_v45  ;;  %v402_v55 = vmax.f32 %v352_v48, 0.0 }
  0xe2   : > { %v354_v51 = vpop.f32.mrf.mxu0  ;;  %741 = vmatmul.mubr.msk.bf16.vlgmr.msra.gmra.mxu1 %vm461_vm1, %v415_v46 }
  0xe3   : > { %v355_v52 = vadd.f32 %v664_v32, %v354_v51  ;;  %v405_v53 = vmax.f32 %v363_v49, 0.0 }
  0xe4   : > { %v726_v54 = vpop.f32.mrf.mxu0 }
  0xe5   : > { %v403_v56 = vmax.f32 %v355_v52, 0.0  ;;  %v417_v60 = vpack.c.bf16 %v405_v53, %v404_v57  ;;  %v376_v0 = vadd.f32 %v726_v54, %v664_v32 }
  0xe6   : > { %v367_v58 = vpop.f32.mrf.mxu0 }
  0xe7   : > { %v416_v59 = vpack.c.bf16 %v403_v56, %v402_v55  ;;  %v368_v62 = vadd.f32 %v664_v32, %v367_v58  ;;  %v408_v7 = vmax.f32 %v376_v0, 0.0 }
  0xe8   : > { %v727_v61 = vpop.f32.mrf.mxu0 }
  0xe9   : > { %v379_v63 = vadd.f32 %v727_v61, %v664_v32  ;;  %744 = vmatprep.mubr.msk.bf16.mxu1 %vm461_vm1, %v416_v59  ;;  %v406_v5 = vmax.f32 %v368_v62, 0.0 }
  0xea   : > { %v370_v1 = vpop.f32.mrf.mxu0  ;;  %745 = vmatmul.mubr.msk.bf16.gmra.mxu1 %vm461_vm1, %v417_v60 }
  0xeb   : > { %v371_v2 = vadd.f32 %v664_v32, %v370_v1  ;;  %v409_v3 = vmax.f32 %v379_v63, 0.0 }
  0xec   : > { %v730_v4 = vpop.f32.mrf.mxu0 }
  0xed   : > { %v407_v6 = vmax.f32 %v371_v2, 0.0  ;;  %v419_v10 = vpack.c.bf16 %v409_v3, %v408_v7  ;;  %v392_v14 = vadd.f32 %v730_v4, %v664_v32 }
  0xee   : > { %v383_v8 = vpop.f32.mrf.mxu0 }
  0xef   : > { %v418_v9 = vpack.c.bf16 %v407_v6, %v406_v5  ;;  %v384_v12 = vadd.f32 %v664_v32, %v383_v8  ;;  %v412_v20 = vmax.f32 %v392_v14, 0.0 }
  0xf0   : > { %v731_v11 = vpop.f32.mrf.mxu0 }
  0xf1   : > { %v395_v13 = vadd.f32 %v731_v11, %v664_v32  ;;  %748 = vmatprep.mubr.msk.bf16.mxu1 %vm461_vm1, %v418_v9  ;;  %v410_v18 = vmax.f32 %v384_v12, 0.0 }
  0xf2   : > { %v386_v15 = vpop.f32.mrf.mxu0  ;;  %749 = vmatmul.mubr.msk.bf16.gmra.mxu1 %vm461_vm1, %v419_v10 }
  0xf3   : > { %v387_v16 = vadd.f32 %v664_v32, %v386_v15  ;;  %v413_v17 = vmax.f32 %v395_v13, 0.0 }
  0xf5   : > { %v411_v19 = vmax.f32 %v387_v16, 0.0  ;;  %v421_v22 = vpack.c.bf16 %v413_v17, %v412_v20 }
  0xf7   : > { %v420_v21 = vpack.c.bf16 %v411_v19, %v410_v18 }
  0xf9   : > { %752 = vmatprep.mubr.msk.bf16.mxu1 %vm461_vm1, %v420_v21 }
  0xfa   : > { %753 = vmatmul.mubr.msk.bf16.gmra.mxu1 %vm461_vm1, %v421_v22 }
 0x1a2   : > { %v742_v24 = vpop.f32.mrf.mxu1 }
 0x1a3   : > { %v529_v25 = vadd.f32 %v742_v24, %v675_v23 }
 0x1a4   : > { %v520_v26 = vpop.f32.mrf.mxu1 }
 0x1a5   : > { %585 = vst.msk [vmem:[%s887_s19 + $0x10] sm:$0xff] %vm276_vm0, %v529_v25  ;;  %v521_v27 = vadd.f32 %v675_v23, %v520_v26 }
 0x1a6   : > { %v743_v28 = vpop.f32.mrf.mxu1 }
 0x1a7   : > { %583 = vst.msk [vmem:[%s887_s19] sm:$0xff] %vm276_vm0, %v521_v27  ;;  %v532_v29 = vadd.f32 %v743_v28, %v675_v23 }
 0x1a8   : > { %v523_v30 = vpop.f32.mrf.mxu1 }
 0x1a9   : > { %586 = vst.msk [vmem:[%s887_s19 + $0x18] sm:$0xff] %vm276_vm0, %v532_v29  ;;  %v524_v31 = vadd.f32 %v675_v23, %v523_v30 }
 0x1aa   : > { %v746_v32 = vpop.f32.mrf.mxu1 }
 0x1ab   : > { %584 = vst.msk [vmem:[%s887_s19 + $0x8] sm:$0xff] %vm276_vm0, %v524_v31  ;;  %v545_v33 = vadd.f32 %v746_v32, %v675_v23 }
 0x1ac   : > { %v536_v34 = vpop.f32.mrf.mxu1 }
 0x1ad   : > { %589 = vst.msk [vmem:[%s887_s19 + $0x30] sm:$0xff] %vm276_vm0, %v545_v33  ;;  %v537_v35 = vadd.f32 %v675_v23, %v536_v34 }
 0x1ae   : > { %v747_v36 = vpop.f32.mrf.mxu1 }
 0x1af   : > { %587 = vst.msk [vmem:[%s887_s19 + $0x20] sm:$0xff] %vm276_vm0, %v537_v35  ;;  %v548_v37 = vadd.f32 %v747_v36, %v675_v23 }
 0x1b0   : > { %v539_v38 = vpop.f32.mrf.mxu1 }
 0x1b1   : > { %590 = vst.msk [vmem:[%s887_s19 + $0x38] sm:$0xff] %vm276_vm0, %v548_v37  ;;  %v540_v39 = vadd.f32 %v675_v23, %v539_v38 }
 0x1b2   : > { %v750_v40 = vpop.f32.mrf.mxu1 }
 0x1b3   : > { %588 = vst.msk [vmem:[%s887_s19 + $0x28] sm:$0xff] %vm276_vm0, %v540_v39  ;;  %v561_v41 = vadd.f32 %v750_v40, %v675_v23 }
 0x1b4   : > { %v552_v42 = vpop.f32.mrf.mxu1 }
 0x1b5   : > { %593 = vst.msk [vmem:[%s887_s19 + $0x50] sm:$0xff] %vm276_vm0, %v561_v41  ;;  %v553_v43 = vadd.f32 %v675_v23, %v552_v42 }
 0x1b6   : > { %v751_v44 = vpop.f32.mrf.mxu1 }
 0x1b7   : > { %591 = vst.msk [vmem:[%s887_s19 + $0x40] sm:$0xff] %vm276_vm0, %v553_v43  ;;  %v564_v45 = vadd.f32 %v751_v44, %v675_v23 }
 0x1b8   : > { %v555_v46 = vpop.f32.mrf.mxu1 }
 0x1b9   : > { %594 = vst.msk [vmem:[%s887_s19 + $0x58] sm:$0xff] %vm276_vm0, %v564_v45  ;;  %v556_v47 = vadd.f32 %v675_v23, %v555_v46 }
 0x1ba   : > { %v754_v48 = vpop.f32.mrf.mxu1 }
 0x1bb   : > { %592 = vst.msk [vmem:[%s887_s19 + $0x48] sm:$0xff] %vm276_vm0, %v556_v47  ;;  %v577_v49 = vadd.f32 %v754_v48, %v675_v23 }
 0x1bc   : > { %v568_v50 = vpop.f32.mrf.mxu1 }
 0x1bd   : > { %597 = vst.msk [vmem:[%s887_s19 + $0x70] sm:$0xff] %vm276_vm0, %v577_v49  ;;  %v569_v51 = vadd.f32 %v675_v23, %v568_v50 }
 0x1be   : > { %v755_v52 = vpop.f32.mrf.mxu1 }
 0x1bf   : > { %595 = vst.msk [vmem:[%s887_s19 + $0x60] sm:$0xff] %vm276_vm0, %v569_v51  ;;  %v580_v53 = vadd.f32 %v755_v52, %v675_v23 }
 0x1c0   : > { %v571_v54 = vpop.f32.mrf.mxu1 }
 0x1c1   : > { %598 = vst.msk [vmem:[%s887_s19 + $0x78] sm:$0xff] %vm276_vm0, %v580_v53  ;;  %v572_v55 = vadd.f32 %v675_v23, %v571_v54 }
 0x1c3   : > { %596 = vst.msk [vmem:[%s887_s19 + $0x68] sm:$0xff] %vm276_vm0, %v572_v55 }
 0x1c4 PF: > { %s15_s18 = sadd.s32 1, %s776_s18  }
 0x1c5   : > { %p12_p4 = scmp.ge.s32.totalorder %s15_s18, 4  }
 0x1c7   :  { %14 = sbr.rel (!%p12_p4) target bundleno = 1 (0x1), region = 70 }

</bundles_post_ra>
